<compile_context>
chip_gen: v5e
topology: v5e:2x2
jax: 0.10.0
libtpu: 0.0.40
codegen_flags: <defaults>
</compile_context>

<pallas_src>
import functools

import numpy as np

import jax
import jax.numpy as jnp
from jax.experimental import pallas as pl
from jax.experimental.pallas import tpu as pltpu

BF16 = jnp.bfloat16
_VMEM_BUDGET = 16 * 1024 * 1024   # target double-buffered block working set
_VMEM_LIMIT = 32 * 1024 * 1024    # scoped VMEM limit, safe on v5e/v6e/v7x


def _round_up(x, m):
    return ((x + m - 1) // m) * m


# ---------------------------------------------------------------------------
# Pallas kernel: (B, G, M, K) x (G, K, N) -> (B, G, M, N) bf16
# fused bias + LeakyReLU epilogue, f32 accumulation on the MXU.
# ---------------------------------------------------------------------------
def _mm_bias_kernel(a_ref, w_ref, bias_ref, o_ref, *, slope):
    acc = jnp.dot(a_ref[0, 0], w_ref[0], preferred_element_type=jnp.float32)
    acc = acc + bias_ref[0]
    if slope is not None:
        acc = jnp.maximum(acc, acc * slope)
    o_ref[0, 0] = acc.astype(o_ref.dtype)


def _mm_nobias_kernel(a_ref, w_ref, o_ref, *, slope):
    acc = jnp.dot(a_ref[0, 0], w_ref[0], preferred_element_type=jnp.float32)
    if slope is not None:
        acc = jnp.maximum(acc, acc * slope)
    o_ref[0, 0] = acc.astype(o_ref.dtype)


def _choose_tiles(M, K, N):
    """Budget-driven tile sizes: double-buffered blocks stay under budget."""
    TN = N if N <= 512 else 256
    tm = 1024
    while tm > 16:
        # bf16 (2 bytes/elem) x 2 for double buffering of A, W and out blocks.
        ws = 4 * (tm * K + K * TN + tm * TN)
        if ws <= _VMEM_BUDGET:
            break
        tm //= 2
    tm = max(16, min(tm, _round_up(M, 16)))
    return tm, TN


@functools.lru_cache(maxsize=None)
def _get_mm_call(B, G, M, K, N, TM, TN, slope, has_bias):
    grid = (B, G, pl.cdiv(M, TM), pl.cdiv(N, TN))
    a_spec = pl.BlockSpec((1, 1, TM, K), lambda b, g, i, j: (b, g, i, 0))
    w_spec = pl.BlockSpec((1, K, TN), lambda b, g, i, j: (g, 0, j))
    o_spec = pl.BlockSpec((1, 1, TM, TN), lambda b, g, i, j: (b, g, i, j))
    if has_bias:
        kernel = functools.partial(_mm_bias_kernel, slope=slope)
        in_specs = [a_spec, w_spec,
                    pl.BlockSpec((1, 1, TN), lambda b, g, i, j: (g, 0, j))]
    else:
        kernel = functools.partial(_mm_nobias_kernel, slope=slope)
        in_specs = [a_spec, w_spec]
    return pl.pallas_call(
        kernel,
        out_shape=jax.ShapeDtypeStruct((B, G, M, N), BF16),
        grid=grid,
        in_specs=in_specs,
        out_specs=o_spec,
        compiler_params=pltpu.CompilerParams(
            dimension_semantics=("parallel", "parallel", "parallel", "parallel"),
            vmem_limit_bytes=_VMEM_LIMIT),
    )


def apply_matmul(a, layer):
    """a: (B, G, M, K).  Returns (B, G, M, N) bf16 with bias+LeakyReLU fused."""
    B, G, M, K = a.shape
    N = layer["n"]
    slope = layer["slope"]
    if layer["use_pallas"]:
        TM, TN = _choose_tiles(M, K, N)
        fn = _get_mm_call(B, G, M, K, N, TM, TN, slope,
                          layer["bias"] is not None)
        if layer["bias"] is not None:
            return fn(a.astype(BF16), layer["w_bf16"], layer["bias3"])
        return fn(a.astype(BF16), layer["w_bf16"])
    # Tiny layers (K < 64 or N < 16): plain VPU/XLA path, no MXU tile waste.
    out = jnp.einsum("bgmk,gkn->bgmn", a.astype(jnp.float32), layer["wmat"])
    if layer["bias"] is not None:
        out = out + layer["bias"][None, :, None, :]
    if slope is not None:
        out = jnp.maximum(out, out * slope)
    return out.astype(BF16)


# ---------------------------------------------------------------------------
# Layer preparation (matmul-ready weights built once, numpy -> device)
# ---------------------------------------------------------------------------
def _prep_matmul(layer, wmat, bias, slope):
    """wmat: (G, K, Ng); bias: (G, Ng) or None."""
    wmat = np.asarray(wmat, dtype=np.float32)
    G, K, Ng = wmat.shape
    use_pallas = (K >= 64) and (Ng >= 16)
    layer.update(slope=slope, n=Ng, g=G, use_pallas=use_pallas)
    bias_np = None if bias is None else np.asarray(bias, dtype=np.float32)
    layer["bias"] = None if bias_np is None else jnp.asarray(bias_np)
    if use_pallas:
        layer["w_bf16"] = jnp.asarray(wmat, dtype=BF16)
        layer["bias3"] = (None if bias_np is None
                          else jnp.asarray(bias_np[:, None, :]))
    else:
        layer["wmat"] = jnp.asarray(wmat)
    return layer


class ParamInit:
    """Deterministic numpy-based parameter init (no device work at build)."""

    def __init__(self, seed=0):
        self._rng = np.random.default_rng(seed)

    def normal(self, shape, scale=0.1):
        return (scale * self._rng.standard_normal(shape)).astype(np.float32)


def make_conv2d(init, cin, cout, ksize, stride=(1, 1), padding=(0, 0),
                dilation=(1, 1), groups=1, bias=True, slope=None):
    kh, kw = ksize
    w = init.normal((cout, cin // groups, kh, kw))
    b = init.normal((cout,), 0.05) if bias else None
    G, Ng, Cg = groups, cout // groups, cin // groups
    # K order = (kh, kw, cin_within_group); matches the im2col patch layout.
    wmat = (w.reshape(G, Ng, Cg, kh, kw)
            .transpose(0, 3, 4, 2, 1)
            .reshape(G, kh * kw * Cg, Ng))
    bmat = None if b is None else b.reshape(G, Ng)
    layer = dict(kind="conv2d", stride=stride, padding=padding,
                 dilation=dilation, kh=kh, kw=kw, cin=cin, cout=cout)
    return _prep_matmul(layer, wmat, bmat, slope)


def make_conv1d(init, cin, cout, k, stride=1, padding=0, groups=1, bias=True,
                slope=None):
    w = init.normal((cout, cin // groups, k))
    b = init.normal((cout,), 0.05) if bias else None
    G, Ng, Cg = groups, cout // groups, cin // groups
    # K order = (tap, cin_within_group)
    wmat = (w.reshape(G, Ng, Cg, k)
            .transpose(0, 3, 2, 1)
            .reshape(G, k * Cg, Ng))
    bmat = None if b is None else b.reshape(G, Ng)
    layer = dict(kind="conv1d", stride=stride, padding=padding, k=k,
                 cin=cin, cout=cout)
    return _prep_matmul(layer, wmat, bmat, slope)


def make_stft_layer(n_fft):
    """Windowed DFT basis with torchaudio 'window' normalization folded in."""
    n = np.arange(n_fft, dtype=np.float64)
    window = 0.5 - 0.5 * np.cos(2.0 * np.pi * n / n_fft)    # periodic hann
    fbins = n_fft // 2 + 1
    ang = 2.0 * np.pi * np.outer(n, np.arange(fbins, dtype=np.float64)) / n_fft
    basis = np.concatenate([np.cos(ang), -np.sin(ang)], axis=1)
    norm = np.sqrt(np.sum(window ** 2))
    wmat = (window[:, None] * basis / norm)[None].astype(np.float32)
    return _prep_matmul(dict(kind="stft"), wmat, None, None)


# ---------------------------------------------------------------------------
# Convolution forwards: lean channels-last im2col -> grouped Pallas matmul.
# Inputs/outputs stay bf16 channels-last; fmaps are converted on return only.
# ---------------------------------------------------------------------------
def conv2d_cl(x, layer):
    """x: (B, H, W, Cin) bf16 channels-last -> (B, Hout, Wout, Cout) bf16."""
    sh, sw = layer["stride"]
    ph, pw = layer["padding"]
    dh, dw = layer["dilation"]
    G, kh, kw = layer["g"], layer["kh"], layer["kw"]
    Ng, cout = layer["n"], layer["cout"]
    B, H, W, Cin = x.shape
    Cg = Cin // G
    Hout = (H + 2 * ph - dh * (kh - 1) - 1) // sh + 1
    Wout = (W + 2 * pw - dw * (kw - 1) - 1) // sw + 1
    xp = jnp.pad(x, ((0, 0), (ph, ph), (pw, pw), (0, 0)))
    w_idx = jnp.asarray(((np.arange(Wout) * sw)[:, None]
                         + (np.arange(kw) * dw)[None, :]).reshape(-1))
    rows = []
    for i in range(kh):
        h0 = i * dh
        sl = xp[:, h0:h0 + sh * (Hout - 1) + 1:sh, :, :]       # (B,Hout,Wp,C)
        sl = jnp.take(sl, w_idx, axis=2, mode="clip")          # (B,Hout,Wout*kw,C)
        rows.append(sl.reshape(B, Hout, Wout, kw, Cin))
    patches = jnp.stack(rows, axis=3)                          # (B,Hout,Wout,kh,kw,C)
    if G == 1:
        a = patches.reshape(B, 1, Hout * Wout, kh * kw * Cin)
    else:
        a = patches.reshape(B, Hout, Wout, kh, kw, G, Cg)
        a = jnp.transpose(a, (0, 5, 1, 2, 3, 4, 6))
        a = a.reshape(B, G, Hout * Wout, kh * kw * Cg)
    out = apply_matmul(a, layer)                               # (B,G,M,Ng)
    out = out.reshape(B, G, Hout, Wout, Ng)
    out = jnp.transpose(out, (0, 2, 3, 1, 4)).reshape(B, Hout, Wout, cout)
    return out


def conv1d_cl(x, layer):
    """x: (B, T, Cin) bf16 channels-last -> (B, Tout, Cout) bf16."""
    s = layer["stride"]
    pad = layer["padding"]
    G, k = layer["g"], layer["k"]
    Ng, cout = layer["n"], layer["cout"]
    B, T, Cin = x.shape
    Cg = Cin // G
    Tout = (T + 2 * pad - k) // s + 1
    xp = jnp.pad(x, ((0, 0), (pad, pad), (0, 0)))
    idx = jnp.asarray(((np.arange(Tout) * s)[:, None]
                       + np.arange(k)[None, :]).reshape(-1))
    patches = jnp.take(xp, idx, axis=1, mode="clip").reshape(B, Tout, k, Cin)
    if G == 1:
        a = patches.reshape(B, 1, Tout, k * Cin)
    else:
        a = patches.reshape(B, Tout, k, G, Cg)
        a = jnp.transpose(a, (0, 3, 1, 2, 4)).reshape(B, G, Tout, k * Cg)
    out = apply_matmul(a, layer)                               # (B,G,M,Ng)
    out = out.reshape(B, G, Tout, Ng)
    out = jnp.transpose(out, (0, 2, 1, 3)).reshape(B, Tout, cout)
    return out


def cl_to_nchw(x):
    """(B, H, W, C) bf16 -> (B, C, H, W) f32 (returned fmap layout)."""
    return jnp.transpose(x, (0, 3, 1, 2)).astype(jnp.float32)


def cl_to_nct(x):
    """(B, T, C) bf16 -> (B, C, T) f32 (returned fmap layout)."""
    return jnp.transpose(x, (0, 2, 1)).astype(jnp.float32)


def avg_pool1d(x, kernel=4, stride=2, pad=2):
    """AvgPool1d(count_include_pad=True) on the VPU (x: (B, C, T) f32)."""
    B, C, T = x.shape
    xp = jnp.pad(x, ((0, 0), (0, 0), (pad, pad)))
    Tout = (T + 2 * pad - kernel) // stride + 1
    acc = None
    for i in range(kernel):
        sl = xp[:, :, i:i + stride * (Tout - 1) + 1:stride]
        acc = sl if acc is None else acc + sl
    return acc / float(kernel)


# ---------------------------------------------------------------------------
# STFT features (center=False, 'window' normalization, periodic hann)
# ---------------------------------------------------------------------------
def stft_features_cl(x, disc):
    """x: (B, C, T) f32 -> channels-last (B, n_frames, fbins, 2*C) bf16."""
    B, C, T = x.shape
    n_fft, hop = disc["n_fft"], disc["hop"]
    n_frames = (T - n_fft) // hop + 1
    idx = jnp.asarray(((np.arange(n_frames) * hop)[:, None]
                       + np.arange(n_fft)[None, :]).reshape(-1))
    frames = jnp.take(x.reshape(B * C, T), idx, axis=1, mode="clip")
    frames = frames.reshape(B * C, 1, n_frames, n_fft)
    spec = apply_matmul(frames, disc["stft"])                  # (B*C,1,nF,2*fbins)
    fbins = n_fft // 2 + 1
    spec = spec.reshape(B, C, n_frames, 2, fbins)
    # torch: cat([z.real, z.imag], dim=1) then 'b c w t -> b c t w'; here we go
    # straight to channels-last with channel order (part, c).
    spec = jnp.transpose(spec, (0, 2, 4, 3, 1)).reshape(B, n_frames, fbins,
                                                        2 * C)
    return spec


# ---------------------------------------------------------------------------
# Parameter construction (weight_norm / spectral_norm == identity at init)
# ---------------------------------------------------------------------------
def get_2d_padding(kernel_size, dilation=(1, 1)):
    return (((kernel_size[0] - 1) * dilation[0]) // 2,
            ((kernel_size[1] - 1) * dilation[1]) // 2)


def build_msstft(init, in_channels=1, out_channels=1, filters=32,
                 n_ffts=(1024, 2048, 512, 256, 128),
                 hop_lengths=(256, 512, 128, 64, 32),
                 win_lengths=(1024, 2048, 512, 256, 128),
                 slope=0.2, max_filters=1024, filters_scale=1,
                 kernel_size=(3, 9), dilations=(1, 2, 4), stride=(1, 2)):
    discs = []
    for n_fft, hop, _win in zip(n_ffts, hop_lengths, win_lengths):
        spec_ch = 2 * in_channels
        convs = [make_conv2d(init, spec_ch, filters, kernel_size,
                             padding=get_2d_padding(kernel_size), slope=slope)]
        in_chs = min(filters_scale * filters, max_filters)
        for i, dil in enumerate(dilations):
            out_chs = min((filters_scale ** (i + 1)) * filters, max_filters)
            convs.append(make_conv2d(
                init, in_chs, out_chs, kernel_size, stride=stride,
                dilation=(dil, 1),
                padding=get_2d_padding(kernel_size, (dil, 1)), slope=slope))
            in_chs = out_chs
        out_chs = min((filters_scale ** (len(dilations) + 1)) * filters,
                      max_filters)
        convs.append(make_conv2d(
            init, in_chs, out_chs, (kernel_size[0], kernel_size[0]),
            padding=get_2d_padding((kernel_size[0], kernel_size[0])),
            slope=slope))
        conv_post = make_conv2d(
            init, out_chs, out_channels, (kernel_size[0], kernel_size[0]),
            padding=get_2d_padding((kernel_size[0], kernel_size[0])),
            slope=None)
        discs.append(dict(n_fft=n_fft, hop=hop, stft=make_stft_layer(n_fft),
                          convs=convs, conv_post=conv_post))
    return discs


def build_scale_disc(init, in_channels=1, out_channels=1,
                     kernel_sizes=(15, 41, 5, 3), channels=128,
                     max_downsample_channels=1024, max_groups=16, bias=False,
                     downsample_scales=(2, 2, 4, 4, 1), slope=0.1):
    layers = [make_conv1d(init, in_channels, channels, kernel_sizes[0],
                          padding=(kernel_sizes[0] - 1) // 2, bias=bias,
                          slope=slope)]
    in_chs, out_chs, groups = channels, channels, 4
    for ds in downsample_scales:
        layers.append(make_conv1d(init, in_chs, out_chs, kernel_sizes[1],
                                  stride=ds,
                                  padding=(kernel_sizes[1] - 1) // 2,
                                  groups=groups, bias=bias, slope=slope))
        in_chs = out_chs
        out_chs = min(in_chs * 2, max_downsample_channels)
        groups = min(groups * 4, max_groups)
    out_chs = min(in_chs * 2, max_downsample_channels)
    layers.append(make_conv1d(init, in_chs, out_chs, kernel_sizes[2], stride=1,
                              padding=(kernel_sizes[2] - 1) // 2, bias=bias,
                              slope=slope))
    layers.append(make_conv1d(init, out_chs, out_channels, kernel_sizes[3],
                              stride=1, padding=(kernel_sizes[3] - 1) // 2,
                              bias=bias, slope=None))
    return layers


def build_period_disc(init, period, in_channels=1, out_channels=1,
                      kernel_sizes=(5, 3), channels=32,
                      downsample_scales=(3, 3, 3, 3, 1),
                      max_downsample_channels=1024, bias=False, slope=0.1):
    convs = []
    in_chs, out_chs = in_channels, channels
    for ds in downsample_scales:
        convs.append(make_conv2d(init, in_chs, out_chs, (kernel_sizes[0], 1),
                                 stride=(ds, 1),
                                 padding=((kernel_sizes[0] - 1) // 2, 0),
                                 bias=bias, slope=slope))
        in_chs = out_chs
        out_chs = min(out_chs * 4, max_downsample_channels)
    output_conv = make_conv2d(init, out_chs, out_channels,
                              (kernel_sizes[1] - 1, 1), stride=(1, 1),
                              padding=((kernel_sizes[1] - 1) // 2, 0),
                              bias=bias, slope=None)
    return dict(period=period, convs=convs, output_conv=output_conv)


def build_hificodec_discriminator_params(init):
    return dict(
        msstft=build_msstft(init),
        msd=[build_scale_disc(init) for _ in range(3)],
        mpd=[build_period_disc(init, p) for p in (2, 3, 5, 7, 11)],
    )


# ---------------------------------------------------------------------------
# Forward passes
# ---------------------------------------------------------------------------
def msstft_forward(x, discs):
    outs = []
    for d in discs:
        z = stft_features_cl(x, d)
        fmap = []
        for c in d["convs"]:
            z = conv2d_cl(z, c)              # LeakyReLU(0.2) fused in-kernel
            fmap.append(cl_to_nchw(z))
        logit = cl_to_nchw(conv2d_cl(z, d["conv_post"]))
        outs.append(fmap + [logit])
    return outs


def msd_forward(x, scale_discs):
    outs = []
    h_in = x                                  # (B, 1, T) f32
    for i, layers in enumerate(scale_discs):
        h = jnp.transpose(h_in, (0, 2, 1)).astype(BF16)   # channels-last
        layer_outs = []
        for layer in layers:
            h = conv1d_cl(h, layer)           # LeakyReLU(0.1) fused (None last)
            layer_outs.append(cl_to_nct(h))
        outs.append(layer_outs)
        if i != len(scale_discs) - 1:
            h_in = avg_pool1d(h_in, 4, 2, 2)
    return outs


def mpd_forward(x, period_discs):
    outs = []
    B, C, T0 = x.shape
    for pd in period_discs:
        p = pd["period"]
        h = x
        T = T0
        if T % p != 0:
            n_pad = p - (T % p)
            h = jnp.pad(h, ((0, 0), (0, 0), (0, n_pad)), mode="reflect")
            T = T + n_pad
        # (B, C, T/p, p) NCHW -> channels-last (B, T/p, p, C)
        h = jnp.transpose(h.reshape(B, C, T // p, p), (0, 2, 3, 1)).astype(BF16)
        layer_outs = []
        for c in pd["convs"]:
            h = conv2d_cl(h, c)
            layer_outs.append(cl_to_nchw(h))
        h = conv2d_cl(h, pd["output_conv"])
        layer_outs.append(cl_to_nchw(h).reshape(B, -1))   # torch.flatten(x,1,-1)
        outs.append(layer_outs)
    return outs


def hificodec_discriminator_forward(x, params):
    """x: (B, 1, T) f32 -> List[List[Array]] (msstft + msd + mpd outputs)."""
    return (msstft_forward(x, params["msstft"])
            + msd_forward(x, params["msd"])
            + mpd_forward(x, params["mpd"]))


# ---------------------------------------------------------------------------
def _selftest_matmul():
    """Check the grouped Pallas matmul against an einsum reference."""
    B, G, M, K, N = 2, 2, 100, 200, 96
    a = jax.random.normal(jax.random.PRNGKey(42), (B, G, M, K), jnp.float32)
    rng = np.random.default_rng(42)
    w = (0.1 * rng.standard_normal((G, K, N))).astype(np.float32)
    b = (0.1 * rng.standard_normal((G, N))).astype(np.float32)
    layer = _prep_matmul({}, w, b, 0.2)
    assert layer["use_pallas"]
    got = apply_matmul(a, layer).astype(jnp.float32)
    ref = jnp.einsum("bgmk,gkn->bgmn", a, jnp.asarray(w)) \
        + jnp.asarray(b)[None, :, None, :]
    ref = jnp.maximum(ref, 0.2 * ref)
    err = float(jnp.max(jnp.abs(got - ref)))
    scale = float(jnp.max(jnp.abs(ref))) + 1e-6
    assert err / scale < 0.08, (err, scale)


if __name__ == "__main__":
    _selftest_matmul()

    # Smallest T with >=1 STFT frame for n_fft=2048 (center=False).
    B, T = 2, 2048
    x = 0.5 * jax.random.normal(jax.random.PRNGKey(0), (B, 1, T),
                                dtype=jnp.float32)

    params = build_hificodec_discriminator_params(ParamInit(seed=0))

    outs = hificodec_discriminator_forward(x, params)
    outs = jax.block_until_ready(outs)

    # Structural checks: 5 STFT discs (6 tensors each) + 3 scales (8 each)
    # + 5 periods (6 each).
    assert len(outs) == 13
    assert [len(o) for o in outs] == [6] * 5 + [8] * 3 + [6] * 5
    assert outs[0][-1].shape[:2] == (B, 1)      # msstft logit (B,1,frames,freq)
    assert outs[5][-1].shape == (B, 1, 32)      # msd scale-0 final conv
    assert outs[8][-1].ndim == 2                # mpd flattened output
    print("KERNEL_OK")
</pallas_src>

<mosaic_0001>
module attributes {stable_mosaic.version = 11 : i64} {
  func.func @_mm_bias_kernel(%arg0: i32, %arg1: i32, %arg2: i32, %arg3: i32, %arg4: memref<1x1x112x200xbf16, #tpu.memory_space<vmem>>, %arg5: memref<1x200x96xbf16, #tpu.memory_space<vmem>>, %arg6: memref<1x1x96xf32, #tpu.memory_space<vmem>>, %arg7: memref<1x1x112x96xbf16, #tpu.memory_space<vmem>>) attributes {dimension_semantics = [#tpu.dimension_semantics<parallel>, #tpu.dimension_semantics<parallel>, #tpu.dimension_semantics<parallel>, #tpu.dimension_semantics<parallel>], iteration_bounds = array<i64: 2, 2, 1, 1>, scalar_prefetch = 0 : i64, scratch_operands = 0 : i64, tpu.core_type = #tpu.core_type<tc>, window_params = [{transform_indices = @transform_0, window_bounds = array<i64: 1, 1, 112, 200>}, {transform_indices = @transform_1, window_bounds = array<i64: 1, 200, 96>}, {transform_indices = @transform_2, window_bounds = array<i64: 1, 1, 96>}, {transform_indices = @transform_3, window_bounds = array<i64: 1, 1, 112, 96>}]} {
    %c0 = arith.constant 0 : index
    %c0_0 = arith.constant 0 : index
    %c0_1 = arith.constant 0 : index
    %c0_2 = arith.constant 0 : index
    %0 = vector.load %arg4[%c0, %c0_0, %c0_1, %c0_2] : memref<1x1x112x200xbf16, #tpu.memory_space<vmem>>, vector<1x1x112x200xbf16>
    %1 = vector.shape_cast %0 : vector<1x1x112x200xbf16> to vector<112x200xbf16>
    %c0_3 = arith.constant 0 : index
    %c0_4 = arith.constant 0 : index
    %c0_5 = arith.constant 0 : index
    %2 = vector.load %arg5[%c0_3, %c0_4, %c0_5] : memref<1x200x96xbf16, #tpu.memory_space<vmem>>, vector<1x200x96xbf16>
    %3 = vector.shape_cast %2 : vector<1x200x96xbf16> to vector<200x96xbf16>
    %cst = arith.constant dense<0.000000e+00> : vector<112x96xf32>
    %4 = tpu.matmul %1, %3, %cst {dimension_numbers = #tpu.dot_dimension_numbers<[1], [0], [0], [1], [0, 0, 1, 1], [], []>} : vector<112x200xbf16>, vector<200x96xbf16>, vector<112x96xf32> -> vector<112x96xf32>
    %c0_6 = arith.constant 0 : index
    %c0_7 = arith.constant 0 : index
    %c0_8 = arith.constant 0 : index
    %5 = vector.load %arg6[%c0_6, %c0_7, %c0_8] : memref<1x1x96xf32, #tpu.memory_space<vmem>>, vector<1x1x96xf32>
    %6 = vector.shape_cast %5 : vector<1x1x96xf32> to vector<1x96xf32>
    %7 = vector.broadcast %6 : vector<1x96xf32> to vector<112x96xf32>
    %8 = arith.addf %4, %7 : vector<112x96xf32>
    %cst_9 = arith.constant 2.000000e-01 : f32
    %9 = vector.broadcast %cst_9 : f32 to vector<112x96xf32>
    %10 = arith.mulf %8, %9 : vector<112x96xf32>
    %11 = arith.maximumf %8, %10 : vector<112x96xf32>
    %12 = arith.truncf %11 : vector<112x96xf32> to vector<112x96xbf16>
    %c0_10 = arith.constant 0 : index
    %c0_11 = arith.constant 0 : index
    %c0_12 = arith.constant 0 : index
    %c0_13 = arith.constant 0 : index
    %13 = vector.load %arg7[%c0_10, %c0_11, %c0_12, %c0_13] : memref<1x1x112x96xbf16, #tpu.memory_space<vmem>>, vector<1x1x112x96xbf16>
    %14 = vector.shape_cast %13 : vector<1x1x112x96xbf16> to vector<112x96xbf16>
    %15 = vector.shape_cast %12 : vector<112x96xbf16> to vector<1x1x112x96xbf16>
    tpu.vector_store %arg7[%c0_10, %c0_11, %c0_12, %c0_13], %15 {strides = array<i32>} : memref<1x1x112x96xbf16, #tpu.memory_space<vmem>>, vector<1x1x112x96xbf16>,
    return
  }
  func.func @transform_0(%arg0: i32, %arg1: i32, %arg2: i32, %arg3: i32) -> (i32, i32, i32, i32) {
    %c0_i32 = arith.constant 0 : i32
    %c0_i32_0 = arith.constant 0 : i32
    return %arg0, %arg1, %arg2, %c0_i32 : i32, i32, i32, i32
  }
  func.func @transform_1(%arg0: i32, %arg1: i32, %arg2: i32, %arg3: i32) -> (i32, i32, i32) {
    %c0_i32 = arith.constant 0 : i32
    %c0_i32_0 = arith.constant 0 : i32
    return %arg1, %c0_i32, %arg3 : i32, i32, i32
  }
  func.func @transform_2(%arg0: i32, %arg1: i32, %arg2: i32, %arg3: i32) -> (i32, i32, i32) {
    %c0_i32 = arith.constant 0 : i32
    %c0_i32_0 = arith.constant 0 : i32
    return %arg1, %c0_i32, %arg3 : i32, i32, i32
  }
  func.func @transform_3(%arg0: i32, %arg1: i32, %arg2: i32, %arg3: i32) -> (i32, i32, i32, i32) {
    %c0_i32 = arith.constant 0 : i32
    return %arg0, %arg1, %arg2, %arg3 : i32, i32, i32, i32
  }
}

</mosaic_0001>

<bundles_post_ra>
// kernel: tpu_custom_call.1
= control target key start
LH: loop header
LB: loop body
LE: loop exit
PB: predicated region body
PF: predicated region fallthrough
CT: control target
= control target key end

     0   :  { %s1351_s12 = smov 0   ;;  %s1353_s13 = smov 0   ;;  %s1593_s0 = inlined_call_operand.vmem [shape: bf16[2,2,100,200], index: 0, kind: input, shape index: {}]   ;;  %s1594_s1 = inlined_call_operand.vmem [shape: bf16[2,200,96], index: 1, kind: input, shape index: {}]   ;;  %s1595_s2 = inlined_call_operand.vmem [shape: f32[2,1,96], index: 2, kind: input, shape index: {}]   ;;  %s1596_s3 = inlined_call_operand.vmem [shape: bf16[2,2,100,96], index: 3, kind: output, shape index: {}]  }
   0x1   :  { %s1355_s14 = smov 0   ;;  %s1357_s15 = smov 0  }
   0x2   :  { %s1359_s16 = smov 0   ;;  %s1361_s17 = smov 0  }
   0x3   :  { %s1363_s18 = smov 0  }
   0x4 LB: > { %s35_s19 = sadd.s32 1, %s1317_s16  ;;  %s39_s20 = sadd.s32 1, %s1321_s17  ;;  %s1325_s18 = sphi %s1363_s18, %s13_s18   ;;  %s1321_s17 = sphi %s1361_s17, %s1603_s17   ;;  %s1317_s16 = sphi %s1359_s16, %s1602_s16   ;;  %s1313_s15 = sphi %s1357_s15, %s1601_s15   ;;  %s1309_s14 = sphi %s1355_s14, %s1600_s14   ;;  %s1305_s13 = sphi %s1353_s13, %s1599_s13   ;;  %s1301_s12 = sphi %s1351_s12, %s1598_s12  }
   0x5   : > { %p37_p0 = scmp.ge.s32.totalorder %s35_s19, 2  ;;  %s994_s21 = sadd.s32 4294967295, %s1325_s18  }
   0x6   : > { %p148_p1 = scmp.ne.s32.totalorder %s1305_s13, %s1301_s12  ;;  %p149_p2 = scmp.eq.s32.totalorder %s994_s21, 3 }
   0x7   : > { %s1605_s19 = smov (%p37_p0, %s35_s19), 0  ;;  %s1607_s20 = smov (!%p37_p0, %s39_s20), %s1321_s17 }
   0x8   : > { %s130_s22 = ssub.s32 %s1317_s16, %s1605_s19  ;;  %p41_p3 = scmp.ge.s32.totalorder %s1607_s20, 2 }
   0x9   : > { %p998_p4 = scmp.ge.s32.totalorder %s1325_s18, 1  ;;  %p1397_p5 = por %p149_p2, %p148_p1 }
   0xa   : > { %p217_p6 = scmp.lt.s32.totalorder %s1325_s18, 5  ;;  %s1609_s20 = smov (%p41_p3, %s1607_s20), 0 }
   0xb   : > { %s129_s24 = ssub.s32 %s1321_s17, %s1609_s20  ;;  %s138_s26 = sadd.s32 1, %s1305_s13 }
   0xc   : > { %p218_p7 = pnand %p998_p4, %p217_p6  ;;  %s131_s25 = sor.u32 %s130_s22, %s129_s24 }
   0xd   : > { %p136_p8 = scmp.eq.s32.totalorder %s131_s25, 0  ;;  %p272_p9 = scmp.lt.s32.totalorder (!%p218_p7), %s1309_s14, 1 }
   0xe   : > { %221 = sbr.rel (%p218_p7) target bundleno = 262 (0x106), region = 32  ;;  %p270_p10 = scmp.lt.s32.totalorder (!%p218_p7), %s1313_s15, 1 }
   0xf   : > { %s1408_s27 = scalar_select %p136_p8, %s1305_s13, %s138_s26  }
  0x10   : > { %s263_s4 = sand.u32 (!%p218_p7), 1, %s1301_s12  }
  0x13   : > { %s1412_s28 = scalar_select %p272_p9, %s1309_s14, 1  ;;  %vm508_vm0 = vcmask 1043456   ;;  %vm486_vm1 = vcmask 588800   ;;  %vm642_vm2 = vcmask 781312  }
  0x14   : > { %s271_s6 = scalar_select %p270_p10, %s1313_s15, 1 }
  0x15   : > { %s1163_s29 = smul.u32 100, %s1412_s28  ;;  %s300_s26 = scalar_lea.vmem %s1595_s2, %s1412_s28 }
  0x16   : > { %s1162_s7 = smul.u32 52, %s271_s6  ;;  %v1485_v59 = vld [vmem:[%s300_s26] ss:$0 sm:$0xff]  ;;  %s1538_s21 = smov (%p1397_p5), 0  }
  0x17   : > { %s1419_s5 = scalar_lea.vmem %s1594_s1, %s1163_s29  ;;  %s1161_s8 = smul.u32 26, %s1412_s28 }
  0x18   : > { %v1142_v0 = vld [vmem:[%s1419_s5 + $0x38] sm:$0xff]  ;;  %v343_v1 = vld [vmem:[%s1419_s5 + $0x60] sm:$0xf]  ;;  %v1141_v3 = vld [vmem:[%s1419_s5 + $0x30] sm:$0xff]  ;;  %s1164_s12 = smul.u32 (%p1397_p5), 13, %s1309_s14 }
  0x19   : > { %v460_v2 = vunpack.c.l.b16 %v343_v1  ;;  %512 = vmatpush.bf16.msra.mxu0 %v1142_v0  ;;  %1147 = vmatpush.bf16.msra.mxu2 %v1142_v0  ;;  %v1146_v6 = vld [vmem:[%s1419_s5 + $0x58] sm:$0xff]  ;;  %v1140_v7 = vld [vmem:[%s1419_s5 + $0x28] sm:$0xff]  ;;  %s280_s9 = sadd.s32 %s1162_s7, %s1161_s8  ;;  %v1145_v8 = vld [vmem:[%s1419_s5 + $0x50] sm:$0xff]  ;;  %s1165_s28 = smul.u32 (%p1397_p5), 26, %s1313_s15 }
  0x1a   : > { %v1139_v9 = vld [vmem:[%s1419_s5 + $0x20] sm:$0xff]  ;;  %s999_s10 = sshll.u32 %s280_s9, 2  ;;  %v1144_v10 = vld [vmem:[%s1419_s5 + $0x48] sm:$0xff]  ;;  %v1138_v11 = vld [vmem:[%s1419_s5 + $0x18] sm:$0xff] }
  0x1b   : > { %v473_v4 = vpack.c.b16 %v460_v2, %v460_v2  ;;  %s1435_s22 = scalar_lea.vmem %s1593_s0, %s999_s10  ;;  %v1143_v12 = vld [vmem:[%s1419_s5 + $0x40] sm:$0xff]  ;;  %v1137_v13 = vld [vmem:[%s1419_s5 + $0x10] sm:$0xff]  ;;  %v1136_v19 = vld [vmem:[%s1419_s5 + $0x8] sm:$0xff]  ;;  %s672_s7 = sadd.s32 (%p1397_p5), %s1165_s28, %s1164_s12 }
  0x1c   : > { %v1121_v14 = vld [vmem:[%s1435_s22 + $0x4] sm:$0xf]  ;;  %v1005_v15 = vld [vmem:[%s1435_s22 + $0x8] sm:$0xf0]  ;;  %v1003_v22 = vld [vmem:[%s1435_s22] sm:$0xf] }
  0x1d   : > { %v510_v5 = vsel %vm508_vm0, %v473_v4, 0  ;;  %513 = vmatpush.bf16.msra.mxu0 %v1141_v3  ;;  %1148 = vmatpush.bf16.msra.mxu2 %v1141_v3  ;;  %v1129_v16 = vld [vmem:[%s1435_s22 + $0x44] sm:$0xf]  ;;  %v1037_v17 = vld [vmem:[%s1435_s22 + $0x48] sm:$0xf0]  ;;  %v1008_v18 = vor.u32 %v1121_v14, %v1005_v15  ;;  %s1112_s8 = sshll.u32 (%p1397_p5), %s672_s7, 2 }
  0x1e   : > { %559 = vmatpush.bf16.msra.mxu1 %v510_v5  ;;  %1155 = vmatpush.bf16.msra.mxu3 %v510_v5  ;;  %v1040_v20 = vor.u32 %v1129_v16, %v1037_v17  ;;  %v1135_v21 = vld [vmem:[%s1419_s5] sm:$0xff]  ;;  %v1122_v23 = vld [vmem:[%s1435_s22 + $0x4] sm:$0xf0]  ;;  %v1027_v24 = vld [vmem:[%s1435_s22 + $0x30] sm:$0xf]  ;;  %s1160_s5 = smul.u32 56, %s263_s4  ;;  %s1536_s11 = scalar_lea.vmem (%p1397_p5), %s1596_s3, %s1112_s8  }
  0x1f   : > { %v1128_v25 = vld [vmem:[%s1435_s22 + $0x34] sm:$0xf0]  ;;  %v1004_v26 = vor.u32 %v1122_v23, %v1003_v22  ;;  %v1123_v28 = vld [vmem:[%s1435_s22 + $0x14] sm:$0xf]  ;;  %v1013_v29 = vld [vmem:[%s1435_s22 + $0x18] sm:$0xf0] }
  0x20   : > { %v1028_v27 = vor.u32 %v1128_v25, %v1027_v24  ;;  %v1131_v30 = vld [vmem:[%s1435_s22 + $0x54] sm:$0xf]  ;;  %v1045_v31 = vld [vmem:[%s1435_s22 + $0x58] sm:$0xf0]  ;;  %v1016_v32 = vor.u32 %v1123_v28, %v1013_v29  ;;  %v1011_v34 = vld [vmem:[%s1435_s22 + $0x10] sm:$0xf] }
  0x21   : > { %514 = vmatpush.bf16.msra.mxu0 %v1140_v7  ;;  %1149 = vmatpush.bf16.msra.mxu2 %v1140_v7  ;;  %v1048_v33 = vor.u32 %v1131_v30, %v1045_v31  ;;  %v1124_v35 = vld [vmem:[%s1435_s22 + $0x14] sm:$0xf0]  ;;  %v1035_v36 = vld [vmem:[%s1435_s22 + $0x40] sm:$0xf]  ;;  %v1130_v37 = vld [vmem:[%s1435_s22 + $0x44] sm:$0xf0] }
  0x22   : > { %560 = vmatpush.bf16.msra.mxu1 %v1146_v6  ;;  %1156 = vmatpush.bf16.msra.mxu3 %v1146_v6  ;;  %v1012_v38 = vor.u32 %v1124_v35, %v1011_v34  ;;  %v1036_v39 = vor.u32 %v1130_v37, %v1035_v36  ;;  %v1125_v40 = vld [vmem:[%s1435_s22 + $0x24] sm:$0xf]  ;;  %v1021_v41 = vld [vmem:[%s1435_s22 + $0x28] sm:$0xf0]  ;;  %v1019_v46 = vld [vmem:[%s1435_s22 + $0x20] sm:$0xf] }
  0x23   : > { %v1133_v42 = vld [vmem:[%s1435_s22 + $0x64] sm:$0xf]  ;;  %v1053_v43 = vld [vmem:[%s1435_s22 + $0x68] sm:$0xf0]  ;;  %v1024_v44 = vor.u32 %v1125_v40, %v1021_v41  ;;  %v1126_v47 = vld [vmem:[%s1435_s22 + $0x24] sm:$0xf0] }
  0x24   : > { %v1056_v45 = vor.u32 %v1133_v42, %v1053_v43  ;;  %v1043_v48 = vld [vmem:[%s1435_s22 + $0x50] sm:$0xf]  ;;  %v1132_v49 = vld [vmem:[%s1435_s22 + $0x54] sm:$0xf0]  ;;  %v1020_v50 = vor.u32 %v1126_v47, %v1019_v46  ;;  %v1127_v52 = vld [vmem:[%s1435_s22 + $0x34] sm:$0xf] }
  0x25   : > { %515 = vmatpush.bf16.msra.mxu0 %v1139_v9  ;;  %1150 = vmatpush.bf16.msra.mxu2 %v1139_v9  ;;  %v1044_v51 = vor.u32 %v1132_v49, %v1043_v48  ;;  %v1029_v53 = vld [vmem:[%s1435_s22 + $0x38] sm:$0xf0]  ;;  %v1051_v55 = vld [vmem:[%s1435_s22 + $0x60] sm:$0xf]  ;;  %v1134_v56 = vld [vmem:[%s1435_s22 + $0x64] sm:$0xf0] }
  0x26   : > { %561 = vmatpush.bf16.msra.mxu1 %v1145_v8  ;;  %1157 = vmatpush.bf16.msra.mxu3 %v1145_v8  ;;  %v1032_v54 = vor.u32 %v1127_v52, %v1029_v53  ;;  %v1052_v57 = vor.u32 %v1134_v56, %v1051_v55  ;;  %s1490_s6 = scalar_lea.vmem [#allocation2], %s1160_s5  }
  0x29   : > { %516 = vmatpush.bf16.msra.mxu0 %v1138_v11  ;;  %1151 = vmatpush.bf16.msra.mxu2 %v1138_v11 }
  0x2a   : > { %562 = vmatpush.bf16.msra.mxu1 %v1144_v10  ;;  %1158 = vmatpush.bf16.msra.mxu3 %v1144_v10 }
  0x2d   : > { %517 = vmatpush.bf16.msra.mxu0 %v1137_v13  ;;  %1152 = vmatpush.bf16.msra.mxu2 %v1137_v13 }
  0x2e   : > { %563 = vmatpush.bf16.msra.mxu1 %v1143_v12  ;;  %1159 = vmatpush.bf16.msra.mxu3 %v1143_v12 }
  0x31   : > { %1105 = vmatmul.msk.bf16.vlgmr.msra.gmra.mxu1 %vm486_vm1, %v1008_v18  ;;  %518 = vmatpush.bf16.msra.mxu0 %v1136_v19 }
  0x32   : > { %1109 = vmatmul.msk.bf16.vlgmr.msra.gmra.mxu3 %vm486_vm1, %v1040_v20  ;;  %1153 = vmatpush.bf16.msra.mxu2 %v1136_v19 }
  0x35   : > { %519 = vmatpush.bf16.msra.mxu0 %v1135_v21 }
  0x36   : > { %1154 = vmatpush.bf16.msra.mxu2 %v1135_v21 }
  0x38   : > { %520 = vmatmul.bf16.vlgmr.msra.gmra.mxu0 %v1004_v26 }
  0x39   : > { %535 = vmatmul.bf16.vlgmr.msra.gmra.mxu2 %v1028_v27 }
  0x41   : > { %1106 = vmatmul.msk.bf16.gmra.mxu1 %vm486_vm1, %v1016_v32 }
  0x42   : > { %1110 = vmatmul.msk.bf16.gmra.mxu3 %vm486_vm1, %v1048_v33 }
  0x48   : > { %525 = vmatmul.bf16.gmra.mxu0 %v1012_v38 }
  0x49   : > { %540 = vmatmul.bf16.gmra.mxu2 %v1036_v39 }
  0x51   : > { %1107 = vmatmul.msk.bf16.gmra.mxu1 %vm486_vm1, %v1024_v44 }
  0x52   : > { %1111 = vmatmul.msk.bf16.gmra.mxu3 %vm486_vm1, %v1056_v45 }
  0x58   : > { %530 = vmatmul.bf16.gmra.mxu0 %v1020_v50 }
  0x59   : > { %545 = vmatmul.bf16.gmra.mxu2 %v1044_v51 }
  0x61   : > { %1108 = vmatmul.msk.bf16.gmra.mxu1 %vm486_vm1, %v1032_v54 }
  0x69   : > { %550 = vmatmul.bf16.gmra.mxu2 %v1052_v57 }
  0xae   : > { %v565_v58 = vpop.f32.mrf.mxu1 }
  0xb5   : > { %v521_v61 = vpop.f32.mrf.mxu0  ;;  %v585_v11 = vpop.f32.mrf.mxu3 }
  0xb6   : > { %v567_v60 = vpop.f32.mrf.mxu1  ;;  %v522_v62 = vadd.f32 %v1485_v59, %v521_v61 }
  0xb8   : > { %v566_v63 = vadd.f32 %v565_v58, %v522_v62 }
  0xba   : > { %v600_v0 = vmul.f32 0.2, %v566_v63 }
  0xbc   : > { %v614_v1 = vmax.f32 %v566_v63, %v600_v0  ;;  %v536_v2 = vpop.f32.mrf.mxu2 }
  0xbd   : > { %v523_v4 = vpop.f32.mrf.mxu0  ;;  %v587_v25 = vpop.f32.mrf.mxu3  ;;  %v537_v45 = vadd.f32 %v1485_v59, %v536_v2 }
  0xbe   : > { %v570_v3 = vpop.f32.mrf.mxu1  ;;  %v628_v5 = vpack.c.bf16 %v614_v1, %v614_v1  ;;  %v524_v6 = vadd.f32 %v1485_v59, %v523_v4 }
  0xc0   : > { %643 = vst.msk [vmem:[%s1490_s6] sm:$0xf] %vm642_vm2, %v628_v5  ;;  %v568_v7 = vadd.f32 %v567_v60, %v524_v6 }
  0xc2   : > { %v601_v8 = vmul.f32 0.2, %v568_v7 }
  0xc4   : > { %v615_v9 = vmax.f32 %v568_v7, %v601_v8  ;;  %v538_v10 = vpop.f32.mrf.mxu2 }
  0xc5   : > { %v526_v13 = vpop.f32.mrf.mxu0  ;;  %v590_v41 = vpop.f32.mrf.mxu3  ;;  %v539_v0 = vadd.f32 %v1485_v59, %v538_v10 }
  0xc6   : > { %v572_v12 = vpop.f32.mrf.mxu1  ;;  %v629_v14 = vpack.c.bf16 %v615_v9, %v615_v9  ;;  %v527_v15 = vadd.f32 %v1485_v59, %v526_v13 }
  0xc8   : > { %644 = vst.msk [vmem:[%s1490_s6 + $0x4] sm:$0xf] %vm642_vm2, %v629_v14  ;;  %v571_v16 = vadd.f32 %v570_v3, %v527_v15 }
  0xca   : > { %v602_v17 = vmul.f32 0.2, %v571_v16 }
  0xcc   : > { %v616_v18 = vmax.f32 %v571_v16, %v602_v17  ;;  %v541_v19 = vpop.f32.mrf.mxu2 }
  0xcd   : > { %v542_v20 = vadd.f32 %v1485_v59, %v541_v19  ;;  %v528_v22 = vpop.f32.mrf.mxu0  ;;  %v592_v62 = vpop.f32.mrf.mxu3 }
  0xce   : > { %v575_v21 = vpop.f32.mrf.mxu1  ;;  %v630_v23 = vpack.c.bf16 %v616_v18, %v616_v18  ;;  %v529_v24 = vadd.f32 %v1485_v59, %v528_v22 }
  0xcf   : > { %v586_v26 = vadd.f32 %v585_v11, %v542_v20 }
  0xd0   : > { %645 = vst.msk [vmem:[%s1490_s6 + $0x8] sm:$0xf] %vm642_vm2, %v630_v23  ;;  %v573_v27 = vadd.f32 %v572_v12, %v529_v24 }
  0xd1   : > { %v608_v28 = vmul.f32 0.2, %v586_v26 }
  0xd2   : > { %v603_v29 = vmul.f32 0.2, %v573_v27 }
  0xd3   : > { %v622_v30 = vmax.f32 %v586_v26, %v608_v28 }
  0xd4   : > { %v617_v31 = vmax.f32 %v573_v27, %v603_v29  ;;  %v543_v32 = vpop.f32.mrf.mxu2 }
  0xd5   : > { %v636_v33 = vpack.c.bf16 %v622_v30, %v622_v30  ;;  %v544_v34 = vadd.f32 %v1485_v59, %v543_v32  ;;  %v531_v36 = vpop.f32.mrf.mxu0  ;;  %v595_v15 = vpop.f32.mrf.mxu3 }
  0xd6   : > { %v577_v35 = vpop.f32.mrf.mxu1  ;;  %v631_v37 = vpack.c.bf16 %v617_v31, %v617_v31  ;;  %v532_v38 = vadd.f32 %v1485_v59, %v531_v36 }
  0xd7   : > { %651 = vst.msk [vmem:[%s1490_s6 + $0x20] sm:$0xf] %vm642_vm2, %v636_v33  ;;  %v588_v39 = vadd.f32 %v587_v25, %v544_v34 }
  0xd8   : > { %646 = vst.msk [vmem:[%s1490_s6 + $0xc] sm:$0xf] %vm642_vm2, %v631_v37  ;;  %v576_v40 = vadd.f32 %v575_v21, %v532_v38 }
  0xd9   : > { %v609_v42 = vmul.f32 0.2, %v588_v39 }
  0xda   : > { %v604_v43 = vmul.f32 0.2, %v576_v40 }
  0xdb   : > { %v623_v44 = vmax.f32 %v588_v39, %v609_v42 }
  0xdc   : > { %v618_v46 = vmax.f32 %v576_v40, %v604_v43  ;;  %v546_v47 = vpop.f32.mrf.mxu2 }
  0xdd   : > { %v637_v48 = vpack.c.bf16 %v623_v44, %v623_v44  ;;  %v547_v49 = vadd.f32 %v1485_v59, %v546_v47  ;;  %v533_v51 = vpop.f32.mrf.mxu0  ;;  %v597_v24 = vpop.f32.mrf.mxu3 }
  0xde   : > { %v580_v50 = vpop.f32.mrf.mxu1  ;;  %v632_v52 = vpack.c.bf16 %v618_v46, %v618_v46  ;;  %v534_v54 = vadd.f32 %v1485_v59, %v533_v51 }
  0xdf   : > { %v581_v53 = vadd.f32 %v580_v50, %v537_v45  ;;  %652 = vst.msk [vmem:[%s1490_s6 + $0x24] sm:$0xf] %vm642_vm2, %v637_v48  ;;  %v591_v55 = vadd.f32 %v590_v41, %v547_v49 }
  0xe0   : > { %647 = vst.msk [vmem:[%s1490_s6 + $0x10] sm:$0xf] %vm642_vm2, %v632_v52  ;;  %v578_v57 = vadd.f32 %v577_v35, %v534_v54 }
  0xe1   : > { %v606_v56 = vmul.f32 0.2, %v581_v53  ;;  %v610_v58 = vmul.f32 0.2, %v591_v55 }
  0xe2   : > { %v605_v61 = vmul.f32 0.2, %v578_v57 }
  0xe3   : > { %v620_v60 = vmax.f32 %v581_v53, %v606_v56  ;;  %v624_v63 = vmax.f32 %v591_v55, %v610_v58 }
  0xe4   : > { %v619_v2 = vmax.f32 %v578_v57, %v605_v61  ;;  %v548_v3 = vpop.f32.mrf.mxu2 }
  0xe5   : > { %v634_v1 = vpack.c.bf16 %v620_v60, %v620_v60  ;;  %v638_v4 = vpack.c.bf16 %v624_v63, %v624_v63  ;;  %v549_v5 = vadd.f32 %v1485_v59, %v548_v3 }
  0xe6   : > { %v582_v6 = vpop.f32.mrf.mxu1  ;;  %v633_v7 = vpack.c.bf16 %v619_v2, %v619_v2 }
  0xe7   : > { %649 = vst.msk [vmem:[%s1490_s6 + $0x18] sm:$0xf] %vm642_vm2, %v634_v1  ;;  %v583_v8 = vadd.f32 %v582_v6, %v539_v0  ;;  %v593_v9 = vadd.f32 %v592_v62, %v549_v5 }
  0xe8   : > { %653 = vst.msk [vmem:[%s1490_s6 + $0x28] sm:$0xf] %vm642_vm2, %v638_v4 }
  0xe9   : > { %648 = vst.msk [vmem:[%s1490_s6 + $0x14] sm:$0xf] %vm642_vm2, %v633_v7  ;;  %v607_v11 = vmul.f32 0.2, %v583_v8  ;;  %v611_v10 = vmul.f32 0.2, %v593_v9 }
  0xeb   : > { %v621_v12 = vmax.f32 %v583_v8, %v607_v11  ;;  %v625_v13 = vmax.f32 %v593_v9, %v611_v10 }
  0xec   : > { %v551_v16 = vpop.f32.mrf.mxu2 }
  0xed   : > { %v635_v14 = vpack.c.bf16 %v621_v12, %v621_v12  ;;  %v639_v17 = vpack.c.bf16 %v625_v13, %v625_v13  ;;  %v552_v18 = vadd.f32 %v1485_v59, %v551_v16 }
  0xef   : > { %650 = vst.msk [vmem:[%s1490_s6 + $0x1c] sm:$0xf] %vm642_vm2, %v635_v14  ;;  %v596_v19 = vadd.f32 %v595_v15, %v552_v18 }
  0xf0   : > { %654 = vst.msk [vmem:[%s1490_s6 + $0x2c] sm:$0xf] %vm642_vm2, %v639_v17 }
  0xf1   : > { %v612_v20 = vmul.f32 0.2, %v596_v19 }
  0xf3   : > { %v626_v21 = vmax.f32 %v596_v19, %v612_v20  ;;  %663 = sbr.rel (!%p1397_p5) target bundleno = 262 (0x106), region = 36 }
  0xf4   : > { %v553_v22 = vpop.f32.mrf.mxu2 }
  0xf5   : > { %v640_v23 = vpack.c.bf16 %v626_v21, %v626_v21 }
  0xf7   : > { %655 = vst.msk [vmem:[%s1490_s6 + $0x30] sm:$0xf] %vm642_vm2, %v640_v23 }
  0xf8 LB: >> { %v695_v59 = vld [vmem:[%s1490_s6] sm:$0xf]  ;;  %v697_v25 = vld [vmem:[%s1490_s6 + $0x4] sm:$0xf]  ;;  %v699_v26 = vld [vmem:[%s1490_s6 + $0x8] sm:$0xf]  ;;  %s1329_s21 = sphi %s1538_s21, %s689_s21  }
  0xf9   : >> { %696 = vst [vmem:[%s1536_s11] sm:$0xf] %v695_v59  ;;  %v701_v27 = vld [vmem:[%s1490_s6 + $0xc] sm:$0xf]  ;;  %v703_v28 = vld [vmem:[%s1490_s6 + $0x10] sm:$0xf]  ;;  %s689_s21 = sadd.s32 1, %s1329_s21  }
  0xfa   : >> { %698 = vst [vmem:[%s1536_s11 + $0x4] sm:$0xf] %v697_v25  ;;  %v705_v29 = vld [vmem:[%s1490_s6 + $0x14] sm:$0xf]  ;;  %v707_v30 = vld [vmem:[%s1490_s6 + $0x18] sm:$0xf] }
  0xfb   : >> { %700 = vst [vmem:[%s1536_s11 + $0x8] sm:$0xf] %v699_v26  ;;  %v709_v31 = vld [vmem:[%s1490_s6 + $0x1c] sm:$0xf]  ;;  %v711_v32 = vld [vmem:[%s1490_s6 + $0x20] sm:$0xf] }
  0xfc   : >> { %702 = vst [vmem:[%s1536_s11 + $0xc] sm:$0xf] %v701_v27  ;;  %v713_v33 = vld [vmem:[%s1490_s6 + $0x24] sm:$0xf]  ;;  %v715_v34 = vld [vmem:[%s1490_s6 + $0x28] sm:$0xf] }
  0xfd   : >> { %704 = vst [vmem:[%s1536_s11 + $0x10] sm:$0xf] %v703_v28  ;;  %v717_v35 = vld [vmem:[%s1490_s6 + $0x2c] sm:$0xf]  ;;  %p688_p11 = scmp.ge.s32.totalorder %s689_s21, 1 }
  0xfe   : >> { %706 = vst [vmem:[%s1536_s11 + $0x14] sm:$0xf] %v705_v29  ;;  %v719_v36 = vld [vmem:[%s1490_s6 + $0x30] sm:$0xf] }
  0xff   : >> { %708 = vst [vmem:[%s1536_s11 + $0x18] sm:$0xf] %v707_v30 }
 0x100   : >> { %710 = vst [vmem:[%s1536_s11 + $0x1c] sm:$0xf] %v709_v31 }
 0x101   : >> { %712 = vst [vmem:[%s1536_s11 + $0x20] sm:$0xf] %v711_v32  ;;  %691 = sbr.rel (!%p688_p11) target bundleno = 248 (0xf8), region = 124 }
 0x102   : >> { %714 = vst [vmem:[%s1536_s11 + $0x24] sm:$0xf] %v713_v33 }
 0x103   : >> { %716 = vst [vmem:[%s1536_s11 + $0x28] sm:$0xf] %v715_v34 }
 0x104   : >> { %718 = vst [vmem:[%s1536_s11 + $0x2c] sm:$0xf] %v717_v35 }
 0x105   : >> { %720 = vst [vmem:[%s1536_s11 + $0x30] sm:$0xf] %v719_v36 }
 0x106 PF: > { %s13_s18 = sadd.s32 1, %s1325_s18   ;;  %s1598_s12 = smov %s1305_s13 }
 0x107   : > { %p10_p12 = scmp.ge.s32.totalorder %s13_s18, 6   ;;  %s1599_s13 = smov %s1408_s27 }
 0x108   : > { %s1600_s14 = smov %s1317_s16  ;;  %s1601_s15 = smov %s1321_s17 }
 0x109   : > { %s1602_s16 = smov %s1605_s19  ;;  %s1603_s17 = smov %s1609_s20 }
 0x10a   :  { %12 = sbr.rel (!%p10_p12) target bundleno = 4 (0x4), region = 146 }

</bundles_post_ra>
